<compile_context>
chip_gen: v7x
topology: tpu7x:2x2x1
jax: 0.10.0
libtpu: 0.0.40
codegen_flags: <defaults>
</compile_context>

<pallas_src>
import jax
import jax.numpy as jnp
from jax import lax
from jax.experimental import pallas as pl
from jax.experimental.pallas import tpu as pltpu


# ----------------------------------------------------------------------------
# Hyper-parameters (the `hp` dict of the PyTorch module), kept small.
# ----------------------------------------------------------------------------
HP = {
    "embedding_dim": 32,
    "num_layers": 2,
    "units_0": 48,
    "kernel_size_0": 5,
    "units_1": 64,
    "kernel_size_1": 3,
}
VOCAB_SIZE = 16
BATCH = 2
SEQ_LEN = 16

_NEG_LARGE = -3.0e38  # finite "-inf" sentinel for the masked max pool


def _make_kernel(batch_tile, seq_len, vocab, kernel_sizes, pad_rows):
    """Kernel refs (per grid step):
         tok_ref  : (batch_tile*L, 1) int32
         w0_ref   : (k0*V, C0) f32      embedding-folded layer-1 weight
         b0_ref   : (1, C0)
         [w_i_ref : (k_i, C_in_i, C_out_i), b_i_ref : (1, C_out_i)]  i >= 1
         wfc_ref  : (1, C_last), bfc_ref : (1, 1)
         out_ref  : (batch_tile, 1)
       scratch:
         tok_pad  : (tile_rows+pad, 1) int32   halo-padded token column
         h_pad_i  : (tile_rows+pad, C_in_i)    halo-padded activations, i >= 1
    """
    num_layers = len(kernel_sizes)
    tile_rows = batch_tile * seq_len
    halo = sum(k - 1 for k in kernel_sizes)
    valid_len = seq_len - halo
    assert valid_len > 0, (
        f"seq_len={seq_len} too small for conv halo={halo}: every pooled "
        "window would be invalid (would give -inf/NaN outputs)")
    assert pad_rows >= max(k - 1 for k in kernel_sizes)
    n_in = 1 + 2 * num_layers + 2  # tok, (w,b) per layer, fc_w, fc_b

    def kernel(*refs):
        tok_ref = refs[0]
        wfc_ref = refs[n_in - 2]
        bfc_ref = refs[n_in - 1]
        out_ref = refs[n_in]
        tok_pad = refs[n_in + 1]
        h_pads = refs[n_in + 2:]

        # ---- stage token ids into the halo-padded scratch (finite zero tail) -
        tok_pad[pl.ds(0, tile_rows), :] = tok_ref[...]
        tok_pad[pl.ds(tile_rows, pad_rows), :] = jnp.zeros((pad_rows, 1),
                                                           jnp.int32)

        # ---- layer 1: embedding folded into the conv weight -------------------
        # Lane block j of the operand is one-hot(tok[p+j]) shifted by j*V, so a
        # single (k0*V)-deep MXU matmul performs the embedding lookup and the
        # conv tap-sum at once.
        k0 = kernel_sizes[0]
        blocks = []
        for j in range(k0):
            tcol = tok_pad[pl.ds(j, tile_rows), :] + (j * vocab)   # (N, 1) i32
            blocks.append(jnp.broadcast_to(tcol, (tile_rows, vocab)))
        tok_slab = jnp.concatenate(blocks, axis=1)                  # (N, k0*V)
        lane_ids = lax.broadcasted_iota(jnp.int32, (tile_rows, k0 * vocab), 1)
        onehot = (tok_slab == lane_ids).astype(jnp.float32)
        w0_ref, b0_ref = refs[1], refs[2]
        h = jnp.dot(onehot, w0_ref[...], preferred_element_type=jnp.float32)
        h = jnp.maximum(h + b0_ref[...], 0.0)

        # ---- layers 2..L: taps via static sublane-offset reads of the scratch -
        for i in range(1, num_layers):
            w_ref = refs[1 + 2 * i]       # (k, C_in, C_out)
            b_ref = refs[2 + 2 * i]       # (1, C_out)
            h_pad = h_pads[i - 1]
            c_in = h.shape[-1]
            h_pad[pl.ds(0, tile_rows), :] = h
            h_pad[pl.ds(tile_rows, pad_rows), :] = jnp.zeros((pad_rows, c_in),
                                                             jnp.float32)
            k = kernel_sizes[i]
            z = jnp.dot(h_pad[pl.ds(0, tile_rows), :], w_ref[0],
                        preferred_element_type=jnp.float32)
            for j in range(1, k):
                z = z + jnp.dot(h_pad[pl.ds(j, tile_rows), :], w_ref[j],
                                preferred_element_type=jnp.float32)
            h = jnp.maximum(z + b_ref[...], 0.0)

        # ---- masked per-row global max pool + Linear(C, 1) --------------------
        # Windows whose halo crossed a batch-row boundary (or the zero tail)
        # are finite garbage; mask them before the reduce.
        c_last = h.shape[-1]
        row_pos = lax.broadcasted_iota(jnp.int32, (tile_rows, c_last), 0)
        valid = (row_pos % seq_len) < valid_len
        hm = jnp.where(valid, h, _NEG_LARGE)
        pooled = jnp.max(hm.reshape(batch_tile, seq_len, c_last), axis=1)
        y = jnp.sum(pooled * wfc_ref[...], axis=1, keepdims=True) + bfc_ref[...]
        out_ref[...] = y

    return kernel


def dynamic_cnn_forward(tokens, emb_table, conv_ws_oik, conv_bs_vec,
                        fc_w_1c, fc_b_vec, *, batch_tile=None):
    """tokens: (B, L) int32. conv_ws_oik: PyTorch-layout (C_out, C_in, k) weights.
    Returns (B, 1) float32, matching DynamicCNN.forward."""
    B, L = tokens.shape
    V, E = emb_table.shape
    num_layers = len(conv_ws_oik)
    kernel_sizes = tuple(int(w.shape[2]) for w in conv_ws_oik)
    in_chs = [int(w.shape[1]) for w in conv_ws_oik]

    if batch_tile is None:
        # TODO(synk): at large batch pick a multi-row tile (rows a multiple of 8
        # sublanes) sized against 32 MiB scoped VMEM (64 MiB physical on v7x).
        batch_tile = B
    assert B % batch_tile == 0
    num_tiles = B // batch_tile
    tile_rows = batch_tile * L
    pad_rows = max(8, -(-(max(kernel_sizes) - 1) // 8) * 8)

    f32 = jnp.float32
    emb_f = emb_table.astype(f32)
    # Fold the embedding into layer-1's weight: rows [j*V:(j+1)*V] = emb @ W0[:,:,j].T
    # TODO(synk): for large vocab (V >~ few hundred) replace this one-hot fold
    # with a scalar-prefetch / DMA row gather of the embedding table.
    w0 = conv_ws_oik[0].astype(f32)                                   # (C0, E, k0)
    w0_fold = jnp.concatenate(
        [emb_f @ w0[:, :, j].T for j in range(kernel_sizes[0])], axis=0)  # (k0*V, C0)
    ws_kio = [jnp.transpose(w.astype(f32), (2, 1, 0)) for w in conv_ws_oik[1:]]
    bs_2d = [b.astype(f32)[None, :] for b in conv_bs_vec]
    fc_w = fc_w_1c.astype(f32)
    fc_b_11 = fc_b_vec.astype(f32)[None, :]

    args = [tokens.reshape(B * L, 1).astype(jnp.int32), w0_fold, bs_2d[0]]
    in_specs = [
        pl.BlockSpec((tile_rows, 1), lambda i: (i, 0)),
        pl.BlockSpec(w0_fold.shape, lambda i: (0, 0)),
        pl.BlockSpec(bs_2d[0].shape, lambda i: (0, 0)),
    ]
    for li in range(1, num_layers):
        args += [ws_kio[li - 1], bs_2d[li]]
        in_specs += [
            pl.BlockSpec(ws_kio[li - 1].shape, lambda i: (0, 0, 0)),
            pl.BlockSpec(bs_2d[li].shape, lambda i: (0, 0)),
        ]
    args += [fc_w, fc_b_11]
    in_specs += [pl.BlockSpec(fc_w.shape, lambda i: (0, 0)),
                 pl.BlockSpec(fc_b_11.shape, lambda i: (0, 0))]

    scratch_shapes = [pltpu.VMEM((tile_rows + pad_rows, 1), jnp.int32)]
    scratch_shapes += [pltpu.VMEM((tile_rows + pad_rows, in_chs[li]), jnp.float32)
                       for li in range(1, num_layers)]

    kernel = _make_kernel(batch_tile, L, V, kernel_sizes, pad_rows)

    return pl.pallas_call(
        kernel,
        out_shape=jax.ShapeDtypeStruct((B, 1), jnp.float32),
        grid_spec=pltpu.PrefetchScalarGridSpec(
            num_scalar_prefetch=0,
            grid=(num_tiles,),
            in_specs=in_specs,
            out_specs=pl.BlockSpec((batch_tile, 1), lambda i: (i, 0)),
            scratch_shapes=scratch_shapes),
        compiler_params=pltpu.CompilerParams(
            dimension_semantics=("parallel",),
            vmem_limit_bytes=32 * 1024 * 1024),
    )(*args)


def reference_forward(tokens, emb_table, conv_ws_oik, conv_bs_vec, fc_w_1c, fc_b_vec):
    """Pure-JAX reference mirroring the PyTorch forward (NCL conv layout)."""
    x = emb_table[tokens].astype(jnp.float32)          # (B, L, E)
    x = jnp.transpose(x, (0, 2, 1))                    # (B, E, L)  == permute(0, 2, 1)
    for w_oik, b in zip(conv_ws_oik, conv_bs_vec):
        x = lax.conv_general_dilated(
            x, w_oik.astype(jnp.float32), window_strides=(1,), padding="VALID",
            dimension_numbers=("NCH", "OIH", "NCH"),
        ) + b[None, :, None]
        x = jnp.maximum(x, 0.0)
    pooled = jnp.max(x, axis=-1)                       # (B, C_last)  AdaptiveMaxPool1d(1)
    return pooled @ fc_w_1c.T + fc_b_vec[None, :]      # (B, 1)


if __name__ == "__main__":
    key = jax.random.PRNGKey(0)
    k_tok, k_emb, k_fc_w, k_fc_b, k_layers = jax.random.split(key, 5)

    # Deterministic synthetic parameters matching the nn.Module init shapes.
    emb_table = jax.random.normal(k_emb, (VOCAB_SIZE, HP["embedding_dim"]),
                                  dtype=jnp.float32) * 0.1

    conv_ws_oik = []   # PyTorch layout: (out_ch, in_ch, k)
    conv_bs_vec = []   # (out_ch,)
    in_ch = HP["embedding_dim"]
    layer_keys = jax.random.split(k_layers, HP["num_layers"] * 2)
    for i in range(HP["num_layers"]):
        out_ch = HP[f"units_{i}"]
        ksz = HP[f"kernel_size_{i}"]
        w = jax.random.normal(layer_keys[2 * i], (out_ch, in_ch, ksz),
                              dtype=jnp.float32) * (1.0 / (in_ch * ksz) ** 0.5)
        b = jax.random.normal(layer_keys[2 * i + 1], (out_ch,), dtype=jnp.float32) * 0.05
        conv_ws_oik.append(w)
        conv_bs_vec.append(b)
        in_ch = out_ch

    fc_w_1c = jax.random.normal(k_fc_w, (1, in_ch), dtype=jnp.float32) * (1.0 / in_ch ** 0.5)
    fc_b_vec = jax.random.normal(k_fc_b, (1,), dtype=jnp.float32) * 0.05

    # Deterministic example input: integer token ids (B, L).
    tokens = jax.random.randint(k_tok, (BATCH, SEQ_LEN), 0, VOCAB_SIZE, dtype=jnp.int32)

    out = dynamic_cnn_forward(tokens, emb_table, conv_ws_oik, conv_bs_vec,
                              fc_w_1c, fc_b_vec)
    out = jax.block_until_ready(out)

    ref = reference_forward(tokens, emb_table, conv_ws_oik, conv_bs_vec,
                            fc_w_1c, fc_b_vec)
    ref = jax.block_until_ready(ref)

    assert out.shape == (BATCH, 1), out.shape
    assert jnp.allclose(out, ref, rtol=1e-4, atol=1e-4), (out, ref)
    print("KERNEL_OK")
</pallas_src>

<mosaic_0001>
module attributes {stable_mosaic.version = 11 : i64} {
  func.func @kernel(%arg0: i32, %arg1: memref<32x1xi32, #tpu.memory_space<vmem>>, %arg2: memref<80x48xf32, #tpu.memory_space<vmem>>, %arg3: memref<1x48xf32, #tpu.memory_space<vmem>>, %arg4: memref<3x48x64xf32, #tpu.memory_space<vmem>>, %arg5: memref<1x64xf32, #tpu.memory_space<vmem>>, %arg6: memref<1x64xf32, #tpu.memory_space<vmem>>, %arg7: memref<1x1xf32, #tpu.memory_space<vmem>>, %arg8: memref<2x1xf32, #tpu.memory_space<vmem>>, %arg9: memref<40x1xi32, #tpu.memory_space<vmem>>, %arg10: memref<40x48xf32, #tpu.memory_space<vmem>>) attributes {dimension_semantics = [#tpu.dimension_semantics<parallel>], iteration_bounds = array<i64: 1>, scalar_prefetch = 0 : i64, scratch_operands = 2 : i64, tpu.core_type = #tpu.core_type<tc>, window_params = [{transform_indices = @transform_0, window_bounds = array<i64: 32, 1>}, {pipeline_mode = #tpu.pipeline_mode<synchronous>, transform_indices = @transform_1, window_bounds = array<i64: 80, 48>}, {pipeline_mode = #tpu.pipeline_mode<synchronous>, transform_indices = @transform_2, window_bounds = array<i64: 1, 48>}, {pipeline_mode = #tpu.pipeline_mode<synchronous>, transform_indices = @transform_3, window_bounds = array<i64: 3, 48, 64>}, {pipeline_mode = #tpu.pipeline_mode<synchronous>, transform_indices = @transform_4, window_bounds = array<i64: 1, 64>}, {pipeline_mode = #tpu.pipeline_mode<synchronous>, transform_indices = @transform_5, window_bounds = array<i64: 1, 64>}, {pipeline_mode = #tpu.pipeline_mode<synchronous>, transform_indices = @transform_6, window_bounds = array<i64: 1, 1>}, {transform_indices = @transform_7, window_bounds = array<i64: 2, 1>}]} {
    %c0 = arith.constant 0 : index
    %c0_0 = arith.constant 0 : index
    %0 = vector.load %arg1[%c0, %c0_0] : memref<32x1xi32, #tpu.memory_space<vmem>>, vector<32x1xi32>
    %c0_1 = arith.constant 0 : index
    %c0_2 = arith.constant 0 : index
    %1 = vector.load %arg9[%c0_1, %c0_2] : memref<40x1xi32, #tpu.memory_space<vmem>>, vector<32x1xi32>
    tpu.vector_store %arg9[%c0_1, %c0_2], %0 {strides = array<i32>} : memref<40x1xi32, #tpu.memory_space<vmem>>, vector<32x1xi32>,
    %c0_i32 = arith.constant 0 : i32
    %2 = vector.broadcast %c0_i32 : i32 to vector<8x1xi32>
    %c32 = arith.constant 32 : index
    %c0_3 = arith.constant 0 : index
    %3 = vector.load %arg9[%c32, %c0_3] : memref<40x1xi32, #tpu.memory_space<vmem>>, vector<8x1xi32>
    tpu.vector_store %arg9[%c32, %c0_3], %2 {strides = array<i32>} : memref<40x1xi32, #tpu.memory_space<vmem>>, vector<8x1xi32>,
    %c0_4 = arith.constant 0 : index
    %c0_5 = arith.constant 0 : index
    %4 = vector.load %arg9[%c0_4, %c0_5] : memref<40x1xi32, #tpu.memory_space<vmem>>, vector<32x1xi32>
    %c0_i32_6 = arith.constant 0 : i32
    %5 = vector.broadcast %c0_i32_6 : i32 to vector<32x1xi32>
    %6 = arith.addi %4, %5 : vector<32x1xi32>
    %7 = vector.shape_cast %6 : vector<32x1xi32> to vector<32x1xi32>
    %8 = vector.broadcast %7 : vector<32x1xi32> to vector<32x16xi32>
    %c1 = arith.constant 1 : index
    %c0_7 = arith.constant 0 : index
    %9 = vector.load %arg9[%c1, %c0_7] : memref<40x1xi32, #tpu.memory_space<vmem>>, vector<32x1xi32>
    %c16_i32 = arith.constant 16 : i32
    %10 = vector.broadcast %c16_i32 : i32 to vector<32x1xi32>
    %11 = arith.addi %9, %10 : vector<32x1xi32>
    %12 = vector.shape_cast %11 : vector<32x1xi32> to vector<32x1xi32>
    %13 = vector.broadcast %12 : vector<32x1xi32> to vector<32x16xi32>
    %c2 = arith.constant 2 : index
    %c0_8 = arith.constant 0 : index
    %14 = vector.load %arg9[%c2, %c0_8] : memref<40x1xi32, #tpu.memory_space<vmem>>, vector<32x1xi32>
    %c32_i32 = arith.constant 32 : i32
    %15 = vector.broadcast %c32_i32 : i32 to vector<32x1xi32>
    %16 = arith.addi %14, %15 : vector<32x1xi32>
    %17 = vector.shape_cast %16 : vector<32x1xi32> to vector<32x1xi32>
    %18 = vector.broadcast %17 : vector<32x1xi32> to vector<32x16xi32>
    %c3 = arith.constant 3 : index
    %c0_9 = arith.constant 0 : index
    %19 = vector.load %arg9[%c3, %c0_9] : memref<40x1xi32, #tpu.memory_space<vmem>>, vector<32x1xi32>
    %c48_i32 = arith.constant 48 : i32
    %20 = vector.broadcast %c48_i32 : i32 to vector<32x1xi32>
    %21 = arith.addi %19, %20 : vector<32x1xi32>
    %22 = vector.shape_cast %21 : vector<32x1xi32> to vector<32x1xi32>
    %23 = vector.broadcast %22 : vector<32x1xi32> to vector<32x16xi32>
    %c4 = arith.constant 4 : index
    %c0_10 = arith.constant 0 : index
    %24 = vector.load %arg9[%c4, %c0_10] : memref<40x1xi32, #tpu.memory_space<vmem>>, vector<32x1xi32>
    %c64_i32 = arith.constant 64 : i32
    %25 = vector.broadcast %c64_i32 : i32 to vector<32x1xi32>
    %26 = arith.addi %24, %25 : vector<32x1xi32>
    %27 = vector.shape_cast %26 : vector<32x1xi32> to vector<32x1xi32>
    %28 = vector.broadcast %27 : vector<32x1xi32> to vector<32x16xi32>
    %29 = tpu.concatenate %8, %13, %18, %23, %28 in 1 : vector<32x16xi32>, vector<32x16xi32>, vector<32x16xi32>, vector<32x16xi32>, vector<32x16xi32> -> vector<32x80xi32>
    %30 = tpu.iota {dimensions = array<i32: 1>} : vector<32x80xi32>
    %31 = arith.cmpi eq, %29, %30 : vector<32x80xi32>
    %32 = arith.extui %31 : vector<32x80xi1> to vector<32x80xi32>
    %33 = arith.sitofp %32 : vector<32x80xi32> to vector<32x80xf32>
    %c0_11 = arith.constant 0 : index
    %c0_12 = arith.constant 0 : index
    %34 = vector.load %arg2[%c0_11, %c0_12] : memref<80x48xf32, #tpu.memory_space<vmem>>, vector<80x48xf32>
    %cst = arith.constant dense<0.000000e+00> : vector<32x48xf32>
    %35 = tpu.matmul %33, %34, %cst {dimension_numbers = #tpu.dot_dimension_numbers<[1], [0], [0], [1], [0, 0, 1, 1], [], []>} : vector<32x80xf32>, vector<80x48xf32>, vector<32x48xf32> -> vector<32x48xf32>
    %c0_13 = arith.constant 0 : index
    %c0_14 = arith.constant 0 : index
    %36 = vector.load %arg3[%c0_13, %c0_14] : memref<1x48xf32, #tpu.memory_space<vmem>>, vector<1x48xf32>
    %37 = vector.broadcast %36 : vector<1x48xf32> to vector<32x48xf32>
    %38 = arith.addf %35, %37 : vector<32x48xf32>
    %cst_15 = arith.constant 0.000000e+00 : f32
    %39 = vector.broadcast %cst_15 : f32 to vector<32x48xf32>
    %40 = arith.maximumf %38, %39 : vector<32x48xf32>
    %c0_16 = arith.constant 0 : index
    %c0_17 = arith.constant 0 : index
    %41 = vector.load %arg10[%c0_16, %c0_17] : memref<40x48xf32, #tpu.memory_space<vmem>>, vector<32x48xf32>
    tpu.vector_store %arg10[%c0_16, %c0_17], %40 {strides = array<i32>} : memref<40x48xf32, #tpu.memory_space<vmem>>, vector<32x48xf32>,
    %cst_18 = arith.constant 0.000000e+00 : f32
    %42 = vector.broadcast %cst_18 : f32 to vector<8x48xf32>
    %c32_19 = arith.constant 32 : index
    %c0_20 = arith.constant 0 : index
    %43 = vector.load %arg10[%c32_19, %c0_20] : memref<40x48xf32, #tpu.memory_space<vmem>>, vector<8x48xf32>
    tpu.vector_store %arg10[%c32_19, %c0_20], %42 {strides = array<i32>} : memref<40x48xf32, #tpu.memory_space<vmem>>, vector<8x48xf32>,
    %c0_21 = arith.constant 0 : index
    %c0_22 = arith.constant 0 : index
    %44 = vector.load %arg10[%c0_21, %c0_22] : memref<40x48xf32, #tpu.memory_space<vmem>>, vector<32x48xf32>
    %c0_23 = arith.constant 0 : index
    %c0_24 = arith.constant 0 : index
    %c0_25 = arith.constant 0 : index
    %45 = vector.load %arg4[%c0_23, %c0_24, %c0_25] : memref<3x48x64xf32, #tpu.memory_space<vmem>>, vector<1x48x64xf32>
    %46 = vector.shape_cast %45 : vector<1x48x64xf32> to vector<48x64xf32>
    %cst_26 = arith.constant dense<0.000000e+00> : vector<32x64xf32>
    %47 = tpu.matmul %44, %46, %cst_26 {dimension_numbers = #tpu.dot_dimension_numbers<[1], [0], [0], [1], [0, 0, 1, 1], [], []>} : vector<32x48xf32>, vector<48x64xf32>, vector<32x64xf32> -> vector<32x64xf32>
    %c1_27 = arith.constant 1 : index
    %c0_28 = arith.constant 0 : index
    %48 = vector.load %arg10[%c1_27, %c0_28] : memref<40x48xf32, #tpu.memory_space<vmem>>, vector<32x48xf32>
    %c1_29 = arith.constant 1 : index
    %c0_30 = arith.constant 0 : index
    %c0_31 = arith.constant 0 : index
    %49 = vector.load %arg4[%c1_29, %c0_30, %c0_31] : memref<3x48x64xf32, #tpu.memory_space<vmem>>, vector<1x48x64xf32>
    %50 = vector.shape_cast %49 : vector<1x48x64xf32> to vector<48x64xf32>
    %cst_32 = arith.constant dense<0.000000e+00> : vector<32x64xf32>
    %51 = tpu.matmul %48, %50, %cst_32 {dimension_numbers = #tpu.dot_dimension_numbers<[1], [0], [0], [1], [0, 0, 1, 1], [], []>} : vector<32x48xf32>, vector<48x64xf32>, vector<32x64xf32> -> vector<32x64xf32>
    %52 = arith.addf %47, %51 : vector<32x64xf32>
    %c2_33 = arith.constant 2 : index
    %c0_34 = arith.constant 0 : index
    %53 = vector.load %arg10[%c2_33, %c0_34] : memref<40x48xf32, #tpu.memory_space<vmem>>, vector<32x48xf32>
    %c2_35 = arith.constant 2 : index
    %c0_36 = arith.constant 0 : index
    %c0_37 = arith.constant 0 : index
    %54 = vector.load %arg4[%c2_35, %c0_36, %c0_37] : memref<3x48x64xf32, #tpu.memory_space<vmem>>, vector<1x48x64xf32>
    %55 = vector.shape_cast %54 : vector<1x48x64xf32> to vector<48x64xf32>
    %cst_38 = arith.constant dense<0.000000e+00> : vector<32x64xf32>
    %56 = tpu.matmul %53, %55, %cst_38 {dimension_numbers = #tpu.dot_dimension_numbers<[1], [0], [0], [1], [0, 0, 1, 1], [], []>} : vector<32x48xf32>, vector<48x64xf32>, vector<32x64xf32> -> vector<32x64xf32>
    %57 = arith.addf %52, %56 : vector<32x64xf32>
    %c0_39 = arith.constant 0 : index
    %c0_40 = arith.constant 0 : index
    %58 = vector.load %arg5[%c0_39, %c0_40] : memref<1x64xf32, #tpu.memory_space<vmem>>, vector<1x64xf32>
    %59 = vector.broadcast %58 : vector<1x64xf32> to vector<32x64xf32>
    %60 = arith.addf %57, %59 : vector<32x64xf32>
    %cst_41 = arith.constant 0.000000e+00 : f32
    %61 = vector.broadcast %cst_41 : f32 to vector<32x64xf32>
    %62 = arith.maximumf %60, %61 : vector<32x64xf32>
    %63 = tpu.iota {dimensions = array<i32: 0>} : vector<32x64xi32>
    %c16_i32_42 = arith.constant 16 : i32
    %c0_i32_43 = arith.constant 0 : i32
    %64 = arith.cmpi eq, %c16_i32_42, %c0_i32_43 : i32
    %c1_i32 = arith.constant 1 : i32
    %65 = arith.select %64, %c1_i32, %c16_i32_42 : i32
    %66 = vector.broadcast %65 : i32 to vector<32x64xi32>
    %67 = arith.remsi %63, %66 : vector<32x64xi32>
    %c0_i32_44 = arith.constant 0 : i32
    %68 = vector.broadcast %c0_i32_44 : i32 to vector<32x64xi32>
    %69 = arith.cmpi ne, %67, %68 : vector<32x64xi32>
    %c0_i32_45 = arith.constant 0 : i32
    %70 = vector.broadcast %c0_i32_45 : i32 to vector<32x64xi32>
    %71 = arith.cmpi slt, %67, %70 : vector<32x64xi32>
    %c0_i32_46 = arith.constant 0 : i32
    %72 = arith.cmpi slt, %65, %c0_i32_46 : i32
    %73 = vector.broadcast %72 : i1 to vector<32x64xi1>
    %74 = vector.broadcast %73 : vector<32x64xi1> to vector<32x64xi1>
    %75 = arith.xori %71, %74 : vector<32x64xi1>
    %76 = arith.andi %75, %69 : vector<32x64xi1>
    %77 = vector.broadcast %65 : i32 to vector<32x64xi32>
    %78 = arith.addi %67, %77 : vector<32x64xi32>
    %79 = arith.select %76, %78, %67 : vector<32x64xi1>, vector<32x64xi32>
    %c10_i32 = arith.constant 10 : i32
    %80 = vector.broadcast %c10_i32 : i32 to vector<32x64xi32>
    %81 = arith.cmpi slt, %79, %80 : vector<32x64xi32>
    %cst_47 = arith.constant -3.000000e+38 : f32
    %82 = vector.broadcast %cst_47 : f32 to vector<32x64xf32>
    %83 = arith.select %81, %62, %82 : vector<32x64xi1>, vector<32x64xf32>
    %84 = vector.shape_cast %83 : vector<32x64xf32> to vector<2x16x64xf32>
    %cst_48 = arith.constant dense<0xFF800000> : vector<2x64xf32>
    %85 = vector.multi_reduction <maximumf>, %84, %cst_48 [1] : vector<2x16x64xf32> to vector<2x64xf32>
    %c0_49 = arith.constant 0 : index
    %c0_50 = arith.constant 0 : index
    %86 = vector.load %arg6[%c0_49, %c0_50] : memref<1x64xf32, #tpu.memory_space<vmem>>, vector<1x64xf32>
    %87 = vector.broadcast %86 : vector<1x64xf32> to vector<2x64xf32>
    %88 = arith.mulf %85, %87 : vector<2x64xf32>
    %cst_51 = arith.constant dense<0.000000e+00> : vector<2xf32>
    %89 = vector.multi_reduction <add>, %88, %cst_51 [1] : vector<2x64xf32> to vector<2xf32>
    %90 = vector.shape_cast %89 : vector<2xf32> to vector<2x1xf32>
    %c0_52 = arith.constant 0 : index
    %c0_53 = arith.constant 0 : index
    %91 = vector.load %arg7[%c0_52, %c0_53] : memref<1x1xf32, #tpu.memory_space<vmem>>, vector<1x1xf32>
    %92 = vector.broadcast %91 : vector<1x1xf32> to vector<2x1xf32>
    %93 = arith.addf %90, %92 : vector<2x1xf32>
    %c0_54 = arith.constant 0 : index
    %c0_55 = arith.constant 0 : index
    %94 = vector.load %arg8[%c0_54, %c0_55] : memref<2x1xf32, #tpu.memory_space<vmem>>, vector<2x1xf32>
    tpu.vector_store %arg8[%c0_54, %c0_55], %93 {strides = array<i32>} : memref<2x1xf32, #tpu.memory_space<vmem>>, vector<2x1xf32>,
    return
  }
  func.func @transform_0(%arg0: i32) -> (i32, i32) {
    %c0_i32 = arith.constant 0 : i32
    %c0_i32_0 = arith.constant 0 : i32
    return %arg0, %c0_i32 : i32, i32
  }
  func.func @transform_1(%arg0: i32) -> (i32, i32) {
    %c0_i32 = arith.constant 0 : i32
    %c0_i32_0 = arith.constant 0 : i32
    %c0_i32_1 = arith.constant 0 : i32
    return %c0_i32, %c0_i32_0 : i32, i32
  }
  func.func @transform_2(%arg0: i32) -> (i32, i32) {
    %c0_i32 = arith.constant 0 : i32
    %c0_i32_0 = arith.constant 0 : i32
    %c0_i32_1 = arith.constant 0 : i32
    return %c0_i32, %c0_i32_0 : i32, i32
  }
  func.func @transform_3(%arg0: i32) -> (i32, i32, i32) {
    %c0_i32 = arith.constant 0 : i32
    %c0_i32_0 = arith.constant 0 : i32
    %c0_i32_1 = arith.constant 0 : i32
    %c0_i32_2 = arith.constant 0 : i32
    return %c0_i32, %c0_i32_0, %c0_i32_1 : i32, i32, i32
  }
  func.func @transform_4(%arg0: i32) -> (i32, i32) {
    %c0_i32 = arith.constant 0 : i32
    %c0_i32_0 = arith.constant 0 : i32
    %c0_i32_1 = arith.constant 0 : i32
    return %c0_i32, %c0_i32_0 : i32, i32
  }
  func.func @transform_5(%arg0: i32) -> (i32, i32) {
    %c0_i32 = arith.constant 0 : i32
    %c0_i32_0 = arith.constant 0 : i32
    %c0_i32_1 = arith.constant 0 : i32
    return %c0_i32, %c0_i32_0 : i32, i32
  }
  func.func @transform_6(%arg0: i32) -> (i32, i32) {
    %c0_i32 = arith.constant 0 : i32
    %c0_i32_0 = arith.constant 0 : i32
    %c0_i32_1 = arith.constant 0 : i32
    return %c0_i32, %c0_i32_0 : i32, i32
  }
  func.func @transform_7(%arg0: i32) -> (i32, i32) {
    %c0_i32 = arith.constant 0 : i32
    %c0_i32_0 = arith.constant 0 : i32
    return %arg0, %c0_i32 : i32, i32
  }
}

</mosaic_0001>

<bundles_post_ra>
// kernel: tpu_custom_call.1
= control target key start
LH: loop header
LB: loop body
LE: loop exit
PB: predicated region body
PF: predicated region fallthrough
CT: control target
= control target key end

     0   :  { %vm32_vm0 = vcmask 7168   ;;  %v974_v0 = vmov 0   ;;  %vm144_vm1 = vcmask 392192   ;;  %v975_v42 = vmov 0.0   ;;  %s1175_s0 = inlined_call_operand.vmem [shape: s32[32,1], index: 0, kind: input, shape index: {}]   ;;  %s1176_s1 = inlined_call_operand.vmem [shape: f32[80,48], index: 1, kind: input, shape index: {}]   ;;  %s1177_s3 = inlined_call_operand.vmem [shape: f32[3,48,64], index: 3, kind: input, shape index: {}]   ;;  %s1178_s2 = inlined_call_operand.vmem [shape: f32[1,48], index: 2, kind: input, shape index: {}]   ;;  %s1179_s6 = inlined_call_operand.<no memory space> [shape: f32[1,1], index: 6, kind: input, shape index: {}]   ;;  %s1180_s4 = inlined_call_operand.vmem [shape: f32[1,64], index: 4, kind: input, shape index: {}]   ;;  %s1181_s5 = inlined_call_operand.vmem [shape: f32[1,64], index: 5, kind: input, shape index: {}]   ;;  %s1182_s7 = inlined_call_operand.vmem [shape: f32[2,1], index: 7, kind: output, shape index: {}]  }
   0x1   :  { %973 = vset.pattern.permute.xlu1 %v974_v0  ;;  %v28_v1 = vld [vmem:[%s1175_s0] sm:$0xff]  ;;  %v29_v2 = vld [vmem:[%s1175_s0 + $0x8] sm:$0xff]  ;;  %v30_v3 = vld [vmem:[%s1175_s0 + $0x10] sm:$0xff]  ;;  %37 = vst.msk [vmem:[#allocation2 + $0x20] sm:$0xff] %vm32_vm0, %v974_v0  ;;  %972 = vset.pattern.permute.xlu0 %v974_v0  ;;  %v154_v63 = vlaneseq  ;;  %vm134_vm2 = vcmask 130048   ;;  %vm139_vm3 = vcmask 261120  }
   0x2   :  { %v31_v4 = vld [vmem:[%s1175_s0 + $0x18] sm:$0xff]  ;;  %33 = vst.msk [vmem:[#allocation2] sm:$0xff] %vm32_vm0, %v28_v1  ;;  %34 = vst.msk [vmem:[#allocation2 + $0x8] sm:$0xff] %vm32_vm0, %v29_v2  ;;  %v168_v5 = vld [vmem:[%s1176_s1] sm:$0xff]  ;;  %vm149_vm4 = vcmask 523264   ;;  %vm185_vm5 = vcmask 654336  }
   0x3   :  { %35 = vst.msk [vmem:[#allocation2 + $0x10] sm:$0xff] %vm32_vm0, %v30_v3  ;;  %36 = vst.msk [vmem:[#allocation2 + $0x18] sm:$0xff] %vm32_vm0, %v31_v4  ;;  %v169_v6 = vld [vmem:[%s1176_s1 + $0x8] sm:$0xff]  ;;  %v170_v20 = vld [vmem:[%s1176_s1 + $0x10] sm:$0xff]  ;;  %v155_v4 = vand.u32 127, %v154_v63  ;;  %vm725_vm12 = vcmask 1041409  }
   0x4   :  { %v906_v7 = vpack.c.bf16 %v169_v6, %v168_v5  ;;  %v171_v21 = vld [vmem:[%s1176_s1 + $0x18] sm:$0xff]  ;;  %v172_v22 = vld [vmem:[%s1176_s1 + $0x20] sm:$0xff]  ;;  %v173_v23 = vld [vmem:[%s1176_s1 + $0x28] sm:$0xff]  ;;  %291 = vst.msk [vmem:[#allocation3 + $0x20] sm:$0xff] %vm144_vm1, %v975_v42  ;;  %vm728_vm13 = vcmask 517120   ;;  %vm740_vm14 = vcmask 1024  }
   0x5   :  { %v910_v24 = vpack.c.bf16 %v171_v21, %v170_v20  ;;  %v914_v25 = vpack.c.bf16 %v173_v23, %v172_v22  ;;  %v174_v30 = vld [vmem:[%s1176_s1 + $0x30] sm:$0xff]  ;;  %v175_v31 = vld [vmem:[%s1176_s1 + $0x38] sm:$0xff]  ;;  %v176_v36 = vld [vmem:[%s1176_s1 + $0x40] sm:$0xff] }
   0x6   :  { %907 = vmatprep.subr.bf16.mxu0 %v906_v7  ;;  %v918_v32 = vpack.c.bf16 %v175_v31, %v174_v30  ;;  %v177_v37 = vld [vmem:[%s1176_s1 + $0x48] sm:$0xff] }
   0x7   :  { %909 = vmatpush3.bf16.msra.mxu0 %v906_v7  ;;  %v922_v38 = vpack.c.bf16 %v177_v37, %v176_v36  ;;  %v297_v36 = vld [vmem:[%s1177_s3 + $0x8] sm:$0xff] }
   0x8   :  { %911 = vmatprep.subr.bf16.mxu0 %v910_v24 }
   0x9   :  { %v39_v8 = vld [vmem:[#allocation2 + $0x8] sm:$0xff]  ;;  %v38_v9 = vld [vmem:[#allocation2] sm:$0xff] }
   0xa   :  { %v55_v10 = vld [vmem:[#allocation2 + $0x9] sm:$0xff]  ;;  %46 = vperm.xlu1 %973, %v39_v8   ;;  %43 = vperm.xlu0 %972, %v38_v9   ;;  %v54_v12 = vld [vmem:[#allocation2 + $0x1] sm:$0xff]  ;;  %v56_v35 = vld [vmem:[#allocation2 + $0x11] sm:$0xff] }
   0xb   :  { %v59_v11 = vadd.s32 16, %v55_v10  ;;  %v58_v13 = vadd.s32 16, %v54_v12  ;;  %v75_v14 = vld [vmem:[#allocation2 + $0xa] sm:$0xff]  ;;  %v74_v15 = vld [vmem:[#allocation2 + $0x2] sm:$0xff]  ;;  %913 = vmatpush3.bf16.msra.mxu0 %v910_v24  ;;  %v60_v39 = vadd.s32 16, %v56_v35  ;;  %v57_v41 = vld [vmem:[#allocation2 + $0x19] sm:$0xff] }
   0xc   :  { %v79_v16 = vadd.s32 32, %v75_v14  ;;  %v78_v17 = vadd.s32 32, %v74_v15  ;;  %v95_v18 = vld [vmem:[#allocation2 + $0xb] sm:$0xff]  ;;  %v94_v19 = vld [vmem:[#allocation2 + $0x3] sm:$0xff]  ;;  %915 = vmatprep.subr.bf16.mxu0 %v914_v25  ;;  %v61_v43 = vadd.s32 16, %v57_v41  ;;  %v41_v44 = vld [vmem:[#allocation2 + $0x18] sm:$0xff] }
   0xd   :  { %v99_v26 = vadd.s32 48, %v95_v18  ;;  %v98_v27 = vadd.s32 48, %v94_v19  ;;  %v115_v28 = vld [vmem:[#allocation2 + $0xc] sm:$0xff]  ;;  %v114_v29 = vld [vmem:[#allocation2 + $0x4] sm:$0xff]  ;;  %v77_v45 = vld [vmem:[#allocation2 + $0x1a] sm:$0xff] }
   0xe   :  { %66 = vperm.xlu1 %973, %v59_v11   ;;  %63 = vperm.xlu0 %972, %v58_v13   ;;  %v119_v33 = vadd.s32 64, %v115_v28  ;;  %v118_v34 = vadd.s32 64, %v114_v29  ;;  %v40_v40 = vld [vmem:[#allocation2 + $0x10] sm:$0xff]  ;;  %v81_v47 = vadd.s32 32, %v77_v45  ;;  %v97_v49 = vld [vmem:[#allocation2 + $0x1b] sm:$0xff] }
   0xf   :  { %917 = vmatpush3.bf16.msra.mxu0 %v914_v25  ;;  %v76_v46 = vld [vmem:[#allocation2 + $0x12] sm:$0xff]  ;;  %v101_v51 = vadd.s32 48, %v97_v49  ;;  %v117_v53 = vld [vmem:[#allocation2 + $0x1c] sm:$0xff] }
  0x10   :  { %919 = vmatprep.subr.bf16.mxu0 %v918_v32  ;;  %v80_v48 = vadd.s32 32, %v76_v46  ;;  %v96_v50 = vld [vmem:[#allocation2 + $0x13] sm:$0xff]  ;;  %v121_v55 = vadd.s32 64, %v117_v53  ;;  %v296_v35 = vld [vmem:[%s1177_s3] sm:$0xff] }
  0x11   :  { %v100_v52 = vadd.s32 48, %v96_v50  ;;  %v116_v54 = vld [vmem:[#allocation2 + $0x14] sm:$0xff]  ;;  %v938_v37 = vpack.c.bf16 %v297_v36, %v296_v35  ;;  %v300_v41 = vld [vmem:[%s1177_s3 + $0x20] sm:$0xff] }
  0x12   :  { %86 = vperm.xlu1 %973, %v79_v16   ;;  %83 = vperm.xlu0 %972, %v78_v17   ;;  %v120_v56 = vadd.s32 64, %v116_v54  ;;  %v756_v45 = vld [vmem:[%s1177_s3 + $0x38] sm:$0xff]  ;;  %v769_v50 = vld [vmem:[%s1177_s3 + $0x60] sm:$0xff]  ;;  %v759_v53 = vld [vmem:[%s1177_s3 + $0x50] sm:$0xff] }
  0x13   :  { %921 = vmatpush3.bf16.msra.mxu0 %v918_v32  ;;  %939 = vmatprep.subr.bf16.mxu1 %v938_v37  ;;  %v760_v54 = vld [vmem:[%s1177_s3 + $0x58] sm:$0xff] }
  0x14   :  { %923 = vmatprep.subr.bf16.mxu0 %v922_v38  ;;  %941 = vmatpush3.bf16.msra.mxu1 %v938_v37 }
  0x16   :  { %106 = vperm.xlu1 %973, %v99_v26   ;;  %103 = vperm.xlu0 %972, %v98_v27  }
  0x17   :  { %925 = vmatpush3.bf16.msra.mxu0 %v922_v38  ;;  %v298_v38 = vld [vmem:[%s1177_s3 + $0x10] sm:$0xff] }
  0x1a   :  { %126 = vperm.xlu1 %973, %v119_v33   ;;  %123 = vperm.xlu0 %972, %v118_v34  }
  0x1e   :  { %69 = vperm.xlu1 %973, %v60_v39   ;;  %49 = vperm.xlu0 %972, %v40_v40   ;;  %v299_v39 = vld [vmem:[%s1177_s3 + $0x18] sm:$0xff] }
  0x1f   :  { %v942_v40 = vpack.c.bf16 %v299_v39, %v298_v38 }
  0x21   :  { %943 = vmatprep.subr.bf16.mxu1 %v942_v40 }
  0x22   :  { %72 = vperm.xlu1 %973, %v61_v43   ;;  %52 = vperm.xlu0 %972, %v41_v44   ;;  %v755_v44 = vld [vmem:[%s1177_s3 + $0x30] sm:$0xff] }
  0x23   :  { %945 = vmatpush3.bf16.msra.mxu1 %v942_v40  ;;  %v926_v46 = vpack.c.bf16 %v756_v45, %v755_v44 }
  0x25   :  { %927 = vmatprep.subr.bf16.mxu0 %v926_v46 }
  0x26   :  { %92 = vperm.xlu1 %973, %v81_v47   ;;  %89 = vperm.xlu0 %972, %v80_v48   ;;  %v757_v47 = vld [vmem:[%s1177_s3 + $0x40] sm:$0xff]  ;;  %v758_v48 = vld [vmem:[%s1177_s3 + $0x48] sm:$0xff] }
  0x27   :  { %v930_v49 = vpack.c.bf16 %v758_v48, %v757_v47 }
  0x2a   :  { %112 = vperm.xlu1 %973, %v101_v51   ;;  %109 = vperm.xlu0 %972, %v100_v52   ;;  %v770_v51 = vld [vmem:[%s1177_s3 + $0x68] sm:$0xff] }
  0x2b   :  { %v950_v52 = vpack.c.bf16 %v770_v51, %v769_v50 }
  0x2e   :  { %132 = vperm.xlu1 %973, %v121_v55   ;;  %129 = vperm.xlu0 %972, %v120_v56   ;;  %v934_v55 = vpack.c.bf16 %v760_v54, %v759_v53  ;;  %v750_v56 = vld [vmem:[%s1178_s2] ss:$0 sm:$0xff] }
  0x89   :  { %v47_v57 = vpop.permute.xlu1 %46  ;;  %v44_v58 = vpop.permute.xlu0 %43 }
  0x8d   :  { %v67_v59 = vpop.permute.xlu1 %66  ;;  %v64_v60 = vpop.permute.xlu0 %63 }
  0x8e   :  { %v136_v2 = vsel %vm134_vm2, %v47_v57, %v67_v59  ;;  %v135_v3 = vsel %vm134_vm2, %v44_v58, %v64_v60 }
  0x91   :  { %v87_v61 = vpop.permute.xlu1 %86  ;;  %v84_v62 = vpop.permute.xlu0 %83 }
  0x92   :  { %v141_v5 = vsel %vm139_vm3, %v136_v2, %v87_v61  ;;  %v140_v6 = vsel %vm139_vm3, %v135_v3, %v84_v62 }
  0x95   :  { %v107_v0 = vpop.permute.xlu1 %106  ;;  %v104_v1 = vpop.permute.xlu0 %103 }
  0x96   :  { %v146_v7 = vsel %vm144_vm1, %v141_v5, %v107_v0  ;;  %v145_v8 = vsel %vm144_vm1, %v140_v6, %v104_v1  ;;  %v771_v0 = vld [vmem:[%s1177_s3 + $0x70] sm:$0xff]  ;;  %v772_v1 = vld [vmem:[%s1177_s3 + $0x78] sm:$0xff]  ;;  %v773_v6 = vld [vmem:[%s1177_s3 + $0x80] sm:$0xff] }
  0x99   :  { %v127_v9 = vpop.permute.xlu1 %126  ;;  %v124_v10 = vpop.permute.xlu0 %123 }
  0x9a   :  { %v151_v11 = vsel %vm149_vm4, %v146_v7, %v127_v9  ;;  %v150_v12 = vsel %vm149_vm4, %v145_v8, %v124_v10  ;;  %v774_v7 = vld [vmem:[%s1177_s3 + $0x88] sm:$0xff] }
  0x9b   :  { %vm157_vm6 = vcmp.eq.s32.totalorder %v151_v11, %v155_v4  ;;  %vm156_vm7 = vcmp.eq.s32.totalorder %v150_v12, %v155_v4  ;;  %v958_v8 = vpack.c.bf16 %v774_v7, %v773_v6  ;;  %v780_v7 = vld [vmem:[%s1181_s5] ss:$0 sm:$0xff] }
  0x9c   :  { %v746_v13 = vsel %vm156_vm7, 1.0, %v975_v42  ;;  %v747_v14 = vsel %vm157_vm6, 1.0, %v975_v42 }
  0x9d   :  { %v70_v15 = vpop.permute.xlu1 %69  ;;  %846 = vmatprep.mubr.msk.f32.mxu0 %vm185_vm5, %v746_v13  ;;  %v50_v16 = vpop.permute.xlu0 %49 }
  0x9e   :  { %847 = vmatmul.mubr.msk.f32.vlgmr.msra.gmra.mrb[0].mxu0 %vm185_vm5, %v747_v14  ;;  %v137_v23 = vsel %vm134_vm2, %v50_v16, %v70_v15 }
  0x9f   :  { %929 = vmatpush3.bf16.msra.mxu0 %v926_v46 }
  0xa0   :  { %931 = vmatprep.subr.bf16.mxu0 %v930_v49 }
  0xa1   :  { %v73_v17 = vpop.permute.xlu1 %72  ;;  %v53_v18 = vpop.permute.xlu0 %52 }
  0xa2   :  { %v138_v24 = vsel %vm134_vm2, %v53_v18, %v73_v17 }
  0xa3   :  { %933 = vmatpush3.bf16.msra.mxu0 %v930_v49 }
  0xa4   :  { %935 = vmatprep.subr.bf16.mxu0 %v934_v55 }
  0xa5   :  { %v93_v19 = vpop.permute.xlu1 %92  ;;  %v90_v20 = vpop.permute.xlu0 %89 }
  0xa6   :  { %v143_v25 = vsel %vm139_vm3, %v138_v24, %v93_v19  ;;  %v142_v26 = vsel %vm139_vm3, %v137_v23, %v90_v20  ;;  %v12_v24 = vstv %s1179_s6 }
  0xa7   :  { %937 = vmatpush3.bf16.msra.mxu0 %v934_v55  ;;  %13 = vst [vmem:[#allocation4] sm:$0x1] %v12_v24 }
  0xa9   :  { %v113_v21 = vpop.permute.xlu1 %112  ;;  %v110_v22 = vpop.permute.xlu0 %109 }
  0xaa   :  { %v148_v27 = vsel %vm144_vm1, %v143_v25, %v113_v21  ;;  %v147_v28 = vsel %vm144_vm1, %v142_v26, %v110_v22  ;;  %v635_v25 = vshrl.u32 %v154_v63, 7 }
  0xad   :  { %v133_v29 = vpop.permute.xlu1 %132  ;;  %v130_v30 = vpop.permute.xlu0 %129 }
  0xae   :  { %v153_v31 = vsel %vm149_vm4, %v148_v27, %v133_v29  ;;  %v152_v32 = vsel %vm149_vm4, %v147_v28, %v130_v30  ;;  %v636_v28 = vadd.s32 8, %v635_v25 }
  0xaf   :  { %vm159_vm8 = vcmp.eq.s32.totalorder %v153_v31, %v155_v4  ;;  %vm158_vm9 = vcmp.eq.s32.totalorder %v152_v32, %v155_v4  ;;  %v954_v4 = vpack.c.bf16 %v772_v1, %v771_v0  ;;  %v779_v32 = vld [vmem:[%s1180_s4] ss:$0 sm:$0xff] }
  0xb0   :  { %v748_v33 = vsel %vm158_vm9, 1.0, %v975_v42  ;;  %v749_v34 = vsel %vm159_vm8, 1.0, %v975_v42  ;;  %v301_v42 = vld [vmem:[%s1177_s3 + $0x28] sm:$0xff] }
  0xb1   :  { %849 = vmatprep.mubr.msk.f32.mxu0 %vm185_vm5, %v748_v33  ;;  %v946_v43 = vpack.c.bf16 %v301_v42, %v300_v41  ;;  %v650_v33 = vand.u32 15, %v636_v28 }
  0xb2   :  { %850 = vmatmul.mubr.msk.f32.gmra.mrb[2].mxu0 %vm185_vm5, %v749_v34  ;;  %v638_v34 = vadd.s32 24, %v635_v25 }
  0xb3   :  { %947 = vmatprep.subr.bf16.mxu1 %v946_v43  ;;  %vm688_vm10 = vcmp.lt.s32.totalorder %v650_v33, 10 }
  0xb4   :  { %949 = vmatpush3.bf16.msra.mxu1 %v946_v43  ;;  %v664_v63 = vand.u32 15, %v638_v34 }
  0xb5   :  { %951 = vmatprep.subr.bf16.mxu1 %v950_v52 }
  0xb6   :  { %vm690_vm11 = vcmp.lt.s32.totalorder %v664_v63, 10 }
 0x171   :  { %v848_v57 = vpop.f32.mrb[0].mxu0 }
 0x172   :  { %v270_v58 = vadd.f32 %v848_v57, %v750_v56  ;;  %v264_v59 = vpop.f32.mrb[1].mxu0 }
 0x173   :  { %v265_v60 = vadd.f32 %v750_v56, %v264_v59 }
 0x174   :  { %v284_v61 = vmax.f32 %v270_v58, 0.0 }
 0x175   :  { %v283_v62 = vmax.f32 %v265_v60, 0.0 }
 0x176   :  { %288 = vst.msk [vmem:[#allocation3 + $0x8] sm:$0xff] %vm144_vm1, %v284_v61 }
 0x177   :  { %287 = vst.msk [vmem:[#allocation3] sm:$0xff] %vm144_vm1, %v283_v62 }
 0x17d   :  { %v293_v5 = vld [vmem:[#allocation3 + $0x8] sm:$0xff] }
 0x17e   :  { %v302_v2 = vld [vmem:[#allocation3 + $0x1] sm:$0xff] }
 0x17f   :  { %v292_v3 = vld [vmem:[#allocation3] sm:$0xff]  ;;  %864 = vmatprep.mubr.msk.f32.mxu0 %vm144_vm1, %v302_v2 }
 0x180   :  { %882 = vmatprep.mubr.msk.f32.mxu1 %vm144_vm1, %v292_v3  ;;  %v507_v19 = vld [vmem:[#allocation3 + $0x2] sm:$0xff] }
 0x181   :  { %883 = vmatmul.mubr.msk.f32.vlgmr.msra.gmra.mrb[0].mxu1 %vm144_vm1, %v293_v5 }
 0x182   :  { %953 = vmatpush3.bf16.msra.mxu1 %v950_v52 }
 0x183   :  { %955 = vmatprep.subr.bf16.mxu1 %v954_v4 }
 0x185   :  { %v851_v9 = vpop.f32.mrb[2].mxu0 }
 0x186   :  { %957 = vmatpush3.bf16.msra.mxu1 %v954_v4  ;;  %v280_v10 = vadd.f32 %v851_v9, %v750_v56  ;;  %v274_v11 = vpop.f32.mrb[3].mxu0 }
 0x187   :  { %959 = vmatprep.subr.bf16.mxu1 %v958_v8  ;;  %v275_v12 = vadd.f32 %v750_v56, %v274_v11 }
 0x188   :  { %v286_v13 = vmax.f32 %v280_v10, 0.0 }
 0x189   :  { %v285_v14 = vmax.f32 %v275_v12, 0.0 }
 0x18a   :  { %961 = vmatpush3.bf16.msra.mxu1 %v958_v8  ;;  %290 = vst.msk [vmem:[#allocation3 + $0x18] sm:$0xff] %vm144_vm1, %v286_v13  ;;  %v781_v13 = vld [vmem:[#allocation4] ss:$0 sm:$0xff] }
 0x18b   :  { %289 = vst.msk [vmem:[#allocation3 + $0x10] sm:$0xff] %vm144_vm1, %v285_v14 }
 0x191   :  { %v295_v18 = vld [vmem:[#allocation3 + $0x18] sm:$0xff] }
 0x192   :  { %v303_v15 = vld [vmem:[#allocation3 + $0x9] sm:$0xff]  ;;  %v304_v17 = vld [vmem:[#allocation3 + $0x11] sm:$0xff]  ;;  %v305_v20 = vld [vmem:[#allocation3 + $0x19] sm:$0xff] }
 0x193   :  { %v294_v16 = vld [vmem:[#allocation3 + $0x10] sm:$0xff]  ;;  %865 = vmatmul.mubr.msk.f32.vlgmr.msra.gmra.mrb[4].mxu0 %vm144_vm1, %v303_v15  ;;  %v510_v23 = vld [vmem:[#allocation3 + $0x1a] sm:$0xff] }
 0x194   :  { %885 = vmatprep.mubr.msk.f32.mxu1 %vm144_vm1, %v294_v16  ;;  %867 = vmatprep.mubr.msk.f32.mxu0 %vm144_vm1, %v304_v17  ;;  %v508_v21 = vld [vmem:[#allocation3 + $0xa] sm:$0xff]  ;;  %v509_v22 = vld [vmem:[#allocation3 + $0x12] sm:$0xff] }
 0x195   :  { %886 = vmatmul.mubr.msk.f32.gmra.mrb[2].mxu1 %vm144_vm1, %v295_v18 }
 0x196   :  { %900 = vmatprep.mubr.msk.f32.mxu1 %vm144_vm1, %v507_v19 }
 0x197   :  { %868 = vmatmul.mubr.msk.f32.gmra.mrb[6].mxu0 %vm144_vm1, %v305_v20 }
 0x199   :  { %901 = vmatmul.mubr.msk.f32.vlgmr.msra.gmra.mrb[0].mxu1 %vm144_vm1, %v508_v21 }
 0x19a   :  { %903 = vmatprep.mubr.msk.f32.mxu1 %vm144_vm1, %v509_v22 }
 0x19d   :  { %904 = vmatmul.mubr.msk.f32.gmra.mrb[2].mxu1 %vm144_vm1, %v510_v23 }
 0x266   :  { %v866_v26 = vpop.f32.mrb[4].mxu0 }
 0x267   :  { %v391_v27 = vpop.f32.mrb[5].mxu0 }
 0x26a   :  { %v869_v29 = vpop.f32.mrb[6].mxu0 }
 0x26b   :  { %v401_v30 = vpop.f32.mrb[7].mxu0 }
 0x26c   :  { %v902_v31 = vpop.f32.mrb[0].mxu1 }
 0x26d   :  { %v962_v35 = vadd.f32 %v902_v31, %v866_v26  ;;  %v596_v36 = vpop.f32.mrb[1].mxu1 }
 0x26e   :  { %v963_v37 = vadd.f32 %v596_v36, %v391_v27 }
 0x26f   :  { %v627_v38 = vadd.f32 %v962_v35, %v779_v32 }
 0x270   :  { %v626_v39 = vadd.f32 %v963_v37, %v779_v32  ;;  %v905_v40 = vpop.f32.mrb[2].mxu1 }
 0x271   :  { %v631_v41 = vmax.f32 %v627_v38, 0.0  ;;  %v964_v42 = vadd.f32 %v905_v40, %v869_v29  ;;  %v606_v43 = vpop.f32.mrb[3].mxu1 }
 0x272   :  { %v630_v44 = vmax.f32 %v626_v39, 0.0  ;;  %v965_v45 = vadd.f32 %v606_v43, %v401_v30 }
 0x273   :  { %v692_v46 = vsel %vm688_vm10, %v631_v41, -3e+38  ;;  %v629_v47 = vadd.f32 %v964_v42, %v779_v32 }
 0x274   :  { %v696_v48 = vsel %vm149_vm4, %v692_v46, -inf  ;;  %v695_v49 = vsel %vm149_vm4, %v630_v44, -inf  ;;  %v628_v50 = vadd.f32 %v965_v45, %v779_v32 }
 0x275   :  { %v697_v51 = vmax.f32 %v695_v49, %v696_v48  ;;  %v633_v52 = vmax.f32 %v629_v47, 0.0 }
 0x276   :  { %v632_v53 = vmax.f32 %v628_v50, 0.0 }
 0x277   :  { %v698_v54 = vrot.slane %v697_v51, 4  ;;  %v694_v55 = vsel %vm690_vm11, %v633_v52, -3e+38 }
 0x278   :  { %v705_v56 = vsel %vm149_vm4, %v694_v55, -inf  ;;  %v704_v57 = vsel %vm149_vm4, %v632_v53, -inf }
 0x279   :  { %v699_v58 = vmax.f32 %v697_v51, %v698_v54  ;;  %v706_v59 = vmax.f32 %v704_v57, %v705_v56 }
 0x27b   :  { %v700_v60 = vrot.slane %v699_v58, 2  ;;  %v707_v61 = vrot.slane %v706_v59, 4 }
 0x27d   :  { %v708_v62 = vmax.f32 %v706_v59, %v707_v61  ;;  %v701_v0 = vmax.f32 %v699_v58, %v700_v60 }
 0x27f   :  { %v709_v1 = vrot.slane %v708_v62, 2  ;;  %v702_v3 = vrot.slane %v701_v0, 1 }
 0x281   :  { %v710_v2 = vmax.f32 %v708_v62, %v709_v1  ;;  %v703_v5 = vmax.f32 %v701_v0, %v702_v3 }
 0x283   :  { %v711_v4 = vrot.slane %v710_v2, 1  ;;  %v720_v9 = vmul.f32 %v780_v7, %v703_v5 }
 0x285   :  { %v712_v6 = vmax.f32 %v710_v2, %v711_v4 }
 0x287   :  { %v721_v8 = vmul.f32 %v780_v7, %v712_v6 }
 0x289   :  { %v724_v10 = vrot.slane %v721_v8, 7 }
 0x28b   :  { %v726_v11 = vsel %vm725_vm12, %v724_v10, %v720_v9 }
 0x28c   :  { %v729_v12 = vsel %vm728_vm13, %v726_v11, 0.0 }
 0x28d   :  { %730 = vadd.xlane.f32.xlu0 %v729_v12 }
 0x31a   :  { %v731_v14 = vpop.xlane.xlu0 %730 }
 0x31b   :  { %v739_v15 = vadd.f32 %v781_v13, %v731_v14 }
 0x31d   :  { %741 = vst.msk [vmem:[%s1182_s7] sm:$0x3] %vm740_vm14, %v739_v15 }

</bundles_post_ra>
